<compile_context>
chip_gen: v7x
topology: tpu7x:2x2x1
jax: 0.10.0
libtpu: 0.0.40
codegen_flags: <defaults>
</compile_context>

<pallas_src>
import functools

import numpy as np
import jax
import jax.numpy as jnp
from jax.experimental import pallas as pl
from jax.experimental.pallas import tpu as pltpu


# ---------------- deterministic parameter construction (from __init__) -------
def _dct_weight_64x64():
    """w[p*8+q, m*8+n] == Conv2d(1,64,8,8).weight[p*8+q, 0, m, n] from the module."""
    m = np.arange(8)
    p = np.arange(8)
    D = np.cos(np.pi * (2 * m[None, :] + 1) * p[:, None] / 16.0)
    D *= np.where(p[:, None] == 0, np.sqrt(1.0 / 8.0), 0.5)
    w = np.einsum("pm,qn->pqmn", D, D).reshape(64, 64)
    return w.astype(np.float32)


_W_DCT_NP = _dct_weight_64x64()               # (64 out-channels, 64 pixel idx)
_W_DCT = jnp.asarray(_W_DCT_NP)


# ---------------- Pallas kernel: channel-major DCT matmul (MXU) --------------
def _dct_channel_major_kernel(p_ref, w_ref, o_ref):
    # (64, 64) @ (64, T): output channels land on sublanes, spatial blocks on
    # lanes -> lane-dense stores for T >= 128, no post-kernel transpose needed.
    o_ref[0] = jnp.dot(w_ref[...], p_ref[0],
                       preferred_element_type=jnp.float32)


def _pick_block_cols(batch, npix, cap=16384):
    """Spatial columns (hb*wb lanes) per kernel block.

    Biggest lane-dense tile that keeps in+out double-buffered blocks well
    inside the 32 MiB scoped-VMEM limit (cap=16384 -> ~16.3 MiB incl. the
    16 KiB weight).  Only nudge the step count to be even -- v7x's two
    TensorCores share the parallel grid -- when that keeps blocks >= 1024
    lanes; v5e/v6e have a single TC where fewer, bigger steps are strictly
    better (~0.35 us fixed cost per grid step).
    """
    if npix < 256:
        return npix                      # tiny input: one full block
    chunks = max(1, pl.cdiv(npix, cap))
    if (batch * chunks) % 2 == 1 and npix // (chunks + 1) >= 1024:
        chunks += 1                      # v7x megacore balance
    t = ((pl.cdiv(npix, chunks) + 127) // 128) * 128
    return max(128, min(t, npix))


def dct_channel_major(patches_t, wmat, block_cols):
    """patches_t: (B, 64, npix) -> (B, 64, npix) DCT coefficients, channel-major."""
    B, K, npix = patches_t.shape          # K == 64
    C = wmat.shape[0]                     # 64 output channels
    grid = (B, pl.cdiv(npix, block_cols))
    return pl.pallas_call(
        _dct_channel_major_kernel,
        out_shape=jax.ShapeDtypeStruct((B, C, npix), jnp.float32),
        grid=grid,
        in_specs=[pl.BlockSpec((1, K, block_cols), lambda b, t: (b, 0, t)),
                  pl.BlockSpec((C, K), lambda b, t: (0, 0))],
        out_specs=pl.BlockSpec((1, C, block_cols), lambda b, t: (b, 0, t)),
        compiler_params=pltpu.CompilerParams(
            dimension_semantics=("parallel", "parallel"),
            vmem_limit_bytes=32 * 1024 * 1024),
    )(patches_t, wmat)


# ---------------- BWDCT forward ----------------------------------------------
@functools.partial(jax.jit, static_argnames=("block_cols",))
def bwdct(x, block_cols=None):
    """x: (B, 1, H, W) float32 -> (B, 64, H//8, W//8). Same math as BWDCT.forward."""
    B, C, H, W = x.shape
    assert C == 1, "BWDCT expects a single input channel"
    assert H % 8 == 0 and W % 8 == 0, "H and W must be multiples of 8"
    hb, wb = H // 8, W // 8
    npix = hb * wb

    # The single remaining XLA relayout (see TODO at top of file): channel-major
    # im2col   patches_t[b, m*8+n, i*wb+j] = x[b, 0, 8i+m, 8j+n].
    patches_t = (x.reshape(B, hb, 8, wb, 8)
                   .transpose(0, 2, 4, 1, 3)
                   .reshape(B, 64, npix))

    bc = _pick_block_cols(B, npix) if block_cols is None else block_cols
    coefs = dct_channel_major(patches_t, _W_DCT, bc)   # (B, 64, hb*wb)
    return coefs.reshape(B, 64, hb, wb)                # free row-major reshape


# ---------------- pure-JAX reference (sanity check only) ---------------------
def _reference(x):
    w = jnp.asarray(_W_DCT_NP.reshape(64, 1, 8, 8))
    return jax.lax.conv_general_dilated(
        x, w, window_strides=(8, 8), padding="VALID",
        dimension_numbers=("NCHW", "OIHW", "NCHW"))


if __name__ == "__main__":
    key = jax.random.PRNGKey(0)
    k1, k2, k3 = jax.random.split(key, 3)

    # 1) module-shaped small input: (B=2, C=1, H=16, W=16) -> (2, 64, 2, 2)
    x1 = jax.random.normal(k1, (2, 1, 16, 16), dtype=jnp.float32)
    y1 = bwdct(x1)
    jax.block_until_ready(y1)
    assert y1.shape == (2, 64, 2, 2), y1.shape
    np.testing.assert_allclose(np.asarray(y1), np.asarray(_reference(x1)),
                               rtol=1e-4, atol=1e-4)

    # 2) odd patch count (3 blocks) -> narrow full-dim lane block, no padding
    x2 = jax.random.normal(k2, (1, 1, 8, 24), dtype=jnp.float32)
    y2 = bwdct(x2)
    jax.block_until_ready(y2)
    assert y2.shape == (1, 64, 1, 3), y2.shape
    np.testing.assert_allclose(np.asarray(y2), np.asarray(_reference(x2)),
                               rtol=1e-4, atol=1e-4)

    # 3) multi-step grid with a partial final lane block (192 cols, block=128)
    x3 = jax.random.normal(k3, (1, 1, 64, 192), dtype=jnp.float32)
    y3 = bwdct(x3, block_cols=128)
    jax.block_until_ready(y3)
    assert y3.shape == (1, 64, 8, 24), y3.shape
    np.testing.assert_allclose(np.asarray(y3), np.asarray(_reference(x3)),
                               rtol=1e-4, atol=1e-4)

    print("KERNEL_OK")
</pallas_src>

<mosaic_0001>
module attributes {stable_mosaic.version = 11 : i64} {
  func.func @_dct_channel_major_kernel(%arg0: i32, %arg1: i32, %arg2: memref<1x64x4xf32, #tpu.memory_space<vmem>>, %arg3: memref<64x64xf32, #tpu.memory_space<vmem>>, %arg4: memref<1x64x4xf32, #tpu.memory_space<vmem>>) attributes {dimension_semantics = [#tpu.dimension_semantics<parallel>, #tpu.dimension_semantics<parallel>], iteration_bounds = array<i64: 2, 1>, scalar_prefetch = 0 : i64, scratch_operands = 0 : i64, tpu.core_type = #tpu.core_type<tc>, window_params = [{transform_indices = @transform_0, window_bounds = array<i64: 1, 64, 4>}, {pipeline_mode = #tpu.pipeline_mode<synchronous>, transform_indices = @transform_1, window_bounds = array<i64: 64, 64>}, {transform_indices = @transform_2, window_bounds = array<i64: 1, 64, 4>}]} {
    %c0 = arith.constant 0 : index
    %c0_0 = arith.constant 0 : index
    %0 = vector.load %arg3[%c0, %c0_0] : memref<64x64xf32, #tpu.memory_space<vmem>>, vector<64x64xf32>
    %c0_1 = arith.constant 0 : index
    %c0_2 = arith.constant 0 : index
    %c0_3 = arith.constant 0 : index
    %1 = vector.load %arg2[%c0_1, %c0_2, %c0_3] : memref<1x64x4xf32, #tpu.memory_space<vmem>>, vector<1x64x4xf32>
    %2 = vector.shape_cast %1 : vector<1x64x4xf32> to vector<64x4xf32>
    %cst = arith.constant dense<0.000000e+00> : vector<64x4xf32>
    %3 = tpu.matmul %0, %2, %cst {dimension_numbers = #tpu.dot_dimension_numbers<[1], [0], [0], [1], [0, 0, 1, 1], [], []>} : vector<64x64xf32>, vector<64x4xf32>, vector<64x4xf32> -> vector<64x4xf32>
    %c0_4 = arith.constant 0 : index
    %c0_5 = arith.constant 0 : index
    %c0_6 = arith.constant 0 : index
    %4 = vector.load %arg4[%c0_4, %c0_5, %c0_6] : memref<1x64x4xf32, #tpu.memory_space<vmem>>, vector<1x64x4xf32>
    %5 = vector.shape_cast %4 : vector<1x64x4xf32> to vector<64x4xf32>
    %6 = vector.shape_cast %3 : vector<64x4xf32> to vector<1x64x4xf32>
    tpu.vector_store %arg4[%c0_4, %c0_5, %c0_6], %6 {strides = array<i32>} : memref<1x64x4xf32, #tpu.memory_space<vmem>>, vector<1x64x4xf32>,
    return
  }
  func.func @transform_0(%arg0: i32, %arg1: i32) -> (i32, i32, i32) {
    %c0_i32 = arith.constant 0 : i32
    %c0_i32_0 = arith.constant 0 : i32
    return %arg0, %c0_i32, %arg1 : i32, i32, i32
  }
  func.func @transform_1(%arg0: i32, %arg1: i32) -> (i32, i32) {
    %c0_i32 = arith.constant 0 : i32
    %c0_i32_0 = arith.constant 0 : i32
    %c0_i32_1 = arith.constant 0 : i32
    return %c0_i32, %c0_i32_0 : i32, i32
  }
  func.func @transform_2(%arg0: i32, %arg1: i32) -> (i32, i32, i32) {
    %c0_i32 = arith.constant 0 : i32
    %c0_i32_0 = arith.constant 0 : i32
    return %arg0, %c0_i32, %arg1 : i32, i32, i32
  }
}

</mosaic_0001>

<bundles_post_ra>
// kernel: bwdct.1
= control target key start
LH: loop header
LB: loop body
LE: loop exit
PB: predicated region body
PF: predicated region fallthrough
CT: control target
= control target key end

     0   :  { %s565_s9 = smov 0   ;;  %s567_s10 = smov 0   ;;  %s645_s0 = inlined_call_operand.vmem [shape: f32[2,64,4], index: 0, kind: input, shape index: {}]   ;;  %s646_s1 = inlined_call_operand.vmem [shape: f32[64,64], index: 1, kind: input, shape index: {}]   ;;  %s647_s2 = inlined_call_operand.vmem [shape: f32[2,64,4], index: 2, kind: output, shape index: {}]  }
   0x1   :  { %s569_s11 = smov 0  }
   0x2 LB: > { %s24_s12 = sadd.s32 1, %s544_s10  ;;  %p417_p0 = scmp.ge.s32.totalorder %s548_s11, 1  ;;  %s548_s11 = sphi %s569_s11, %s12_s11   ;;  %s544_s10 = sphi %s567_s10, %s649_s10   ;;  %s540_s9 = sphi %s565_s9, %s648_s9  }
   0x3   : > { %p26_p1 = scmp.ge.s32.totalorder %s24_s12, 2  ;;  %p131_p2 = scmp.lt.s32.totalorder %s548_s11, 3 }
   0x5   : > { %s651_s12 = smov (%p26_p1, %s24_s12), 0  ;;  %p132_p3 = pnand %p417_p0, %p131_p2 }
   0x6   : > { %p159_p4 = scmp.lt.s32.totalorder (!%p132_p3), %s540_s9, 1  ;;  %v175_v0 = vld [vmem:[%s646_s1] sm:$0xff] (!%p132_p3)  ;;  %vm191_vm0 = vcmask (!%p132_p3), 523264   ;;  %v176_v14 = vld [vmem:[%s646_s1 + $0x8] sm:$0xff] (!%p132_p3)  ;;  %v177_v16 = vld [vmem:[%s646_s1 + $0x10] sm:$0xff] (!%p132_p3)  ;;  %vm321_vm1 = vcmask (!%p132_p3), 31744  }
   0x7   : > { %135 = sbr.rel (%p132_p3) target bundleno = 254 (0xfe), region = 28  ;;  %v179_v1 = vld [vmem:[%s646_s1 + $0x20] sm:$0xff] (!%p132_p3)  ;;  %466 = vmatprep.mubr.msk.f32.mxu0 (!%p132_p3), %vm191_vm0, %v175_v0  ;;  %v180_v15 = vld [vmem:[%s646_s1 + $0x28] sm:$0xff] (!%p132_p3)  ;;  %v181_v17 = vld [vmem:[%s646_s1 + $0x30] sm:$0xff] (!%p132_p3) }
   0x8   : > { %472 = vmatprep.mubr.msk.f32.mxu1 (!%p132_p3), %vm191_vm0, %v179_v1  ;;  %v178_v18 = vld [vmem:[%s646_s1 + $0x18] sm:$0xff] (!%p132_p3) }
   0x9   : > { %v182_v19 = vld [vmem:[%s646_s1 + $0x38] sm:$0xff] (!%p132_p3) }
   0xe   : > { %s653_s9 = smov (!%p159_p4, %s540_s9), 1 }
   0xf   : > { %s432_s17 = sshll.u32 %s653_s9, 6 }
  0x10   : > { %s166_s20 = scalar_lea.vmem %s645_s0, %s432_s17  ;;  %s174_s7 = scalar_lea.vmem %s647_s2, %s432_s17 }
  0x11   : > { %v183_v2 = vld [vmem:[%s166_s20] sm:$0xff]  ;;  %v184_v3 = vld [vmem:[%s166_s20 + $0x8] sm:$0xff]  ;;  %v185_v4 = vld [vmem:[%s166_s20 + $0x10] sm:$0xff] }
  0x12   : > { %v478_v5 = vpack.c.bf16 %v184_v3, %v183_v2  ;;  %v186_v6 = vld [vmem:[%s166_s20 + $0x18] sm:$0xff]  ;;  %v187_v8 = vld [vmem:[%s166_s20 + $0x20] sm:$0xff]  ;;  %v188_v9 = vld [vmem:[%s166_s20 + $0x28] sm:$0xff] }
  0x13   : > { %v482_v7 = vpack.c.bf16 %v186_v6, %v185_v4  ;;  %v486_v10 = vpack.c.bf16 %v188_v9, %v187_v8  ;;  %v189_v11 = vld [vmem:[%s166_s20 + $0x30] sm:$0xff]  ;;  %v190_v12 = vld [vmem:[%s166_s20 + $0x38] sm:$0xff] }
  0x14   : > { %479 = vmatprep.subr.bf16.mxu0 %v478_v5  ;;  %494 = vmatprep.subr.bf16.mxu1 %v478_v5  ;;  %v490_v13 = vpack.c.bf16 %v190_v12, %v189_v11 }
  0x15   : > { %481 = vmatpush3.bf16.msra.mxu0 %v478_v5  ;;  %498 = vmatpush3.bf16.msra.mxu1 %v478_v5 }
  0x16   : > { %483 = vmatprep.subr.bf16.mxu0 %v482_v7  ;;  %495 = vmatprep.subr.bf16.mxu1 %v482_v7 }
  0x19   : > { %485 = vmatpush3.bf16.msra.mxu0 %v482_v7  ;;  %499 = vmatpush3.bf16.msra.mxu1 %v482_v7 }
  0x1a   : > { %487 = vmatprep.subr.bf16.mxu0 %v486_v10  ;;  %496 = vmatprep.subr.bf16.mxu1 %v486_v10 }
  0x1d   : > { %489 = vmatpush3.bf16.msra.mxu0 %v486_v10  ;;  %500 = vmatpush3.bf16.msra.mxu1 %v486_v10 }
  0x1e   : > { %491 = vmatprep.subr.bf16.mxu0 %v490_v13  ;;  %497 = vmatprep.subr.bf16.mxu1 %v490_v13 }
  0x21   : > { %493 = vmatpush3.bf16.msra.mxu0 %v490_v13  ;;  %501 = vmatpush3.bf16.msra.mxu1 %v490_v13 }
  0x24   : > { %467 = vmatmul.mubr.msk.f32.vlgmr.msra.gmra.mrb[0].mxu0 %vm191_vm0, %v176_v14  ;;  %473 = vmatmul.mubr.msk.f32.vlgmr.msra.gmra.mrb[0].mxu1 %vm191_vm0, %v180_v15 }
  0x25   : > { %469 = vmatprep.mubr.msk.f32.mxu0 %vm191_vm0, %v177_v16  ;;  %475 = vmatprep.mubr.msk.f32.mxu1 %vm191_vm0, %v181_v17 }
  0x28   : > { %470 = vmatmul.mubr.msk.f32.gmra.mrb[2].mxu0 %vm191_vm0, %v178_v18  ;;  %476 = vmatmul.mubr.msk.f32.gmra.mrb[2].mxu1 %vm191_vm0, %v182_v19 }
  0xf7   : > { %v468_v20 = vpop.f32.mrb[0].mxu0  ;;  %v474_v21 = vpop.f32.mrb[0].mxu1 }
  0xf8   : > { %323 = vst.msk [vmem:[%s174_s7 + $0x8] sm:$0xff] %vm321_vm1, %v468_v20  ;;  %327 = vst.msk [vmem:[%s174_s7 + $0x28] sm:$0xff] %vm321_vm1, %v474_v21  ;;  %v282_v22 = vpop.f32.mrb[1].mxu0  ;;  %v302_v23 = vpop.f32.mrb[1].mxu1 }
  0xf9   : > { %322 = vst.msk [vmem:[%s174_s7] sm:$0xff] %vm321_vm1, %v282_v22  ;;  %326 = vst.msk [vmem:[%s174_s7 + $0x20] sm:$0xff] %vm321_vm1, %v302_v23 }
  0xfb   : > { %v471_v24 = vpop.f32.mrb[2].mxu0  ;;  %v477_v25 = vpop.f32.mrb[2].mxu1 }
  0xfc   : > { %325 = vst.msk [vmem:[%s174_s7 + $0x18] sm:$0xff] %vm321_vm1, %v471_v24  ;;  %329 = vst.msk [vmem:[%s174_s7 + $0x38] sm:$0xff] %vm321_vm1, %v477_v25  ;;  %v292_v26 = vpop.f32.mrb[3].mxu0  ;;  %v312_v27 = vpop.f32.mrb[3].mxu1 }
  0xfd   : > { %324 = vst.msk [vmem:[%s174_s7 + $0x10] sm:$0xff] %vm321_vm1, %v292_v26  ;;  %328 = vst.msk [vmem:[%s174_s7 + $0x30] sm:$0xff] %vm321_vm1, %v312_v27 }
  0xfe PF: > { %s12_s11 = sadd.s32 1, %s548_s11   ;;  %s648_s9 = smov %s544_s10 }
  0xff   : > { %p9_p5 = scmp.ge.s32.totalorder %s12_s11, 4   ;;  %s649_s10 = smov %s651_s12 }
 0x101   :  { %11 = sbr.rel (!%p9_p5) target bundleno = 2 (0x2), region = 58 }

</bundles_post_ra>
